<compile_context>
chip_gen: v6e
topology: v6e:2x2x1
jax: 0.10.0
libtpu: 0.0.40
codegen_flags: <defaults>
</compile_context>

<pallas_src>
import jax
import jax.numpy as jnp
from jax import lax
from jax.experimental import pallas as pl
from jax.experimental.pallas import tpu as pltpu


def embeddings_kernel(ids_ref, seg_ids_ref,        # scalar-prefetch refs (SMEM)
                      tok_hbm_ref,                 # (V, H) token table, stays in HBM
                      seg_tab_ref,                 # (1, H) segment table, VMEM
                      pos_ref,                     # (T, H) positional tile, VMEM
                      out_ref,                     # (T, H) output tile, VMEM
                      gather_buf,                  # (T, H) VMEM scratch (gathered rows)
                      dma_sem):                    # DMA semaphore
    del seg_ids_ref  # nn.Embedding(num_embeddings=1): the only valid segment id is 0.

    s = pl.program_id(0)
    b = pl.program_id(1)
    T, _ = out_ref.shape
    seq_len = pl.num_programs(0) * T
    base = b * seq_len + s * T          # flat index of this tile's first token

    # --- token-embedding gather: one row DMA per token -----------------------
    # Issue all T copies first (they proceed concurrently), then wait for all.
    def _issue(r, carry):
        tok_id = ids_ref[base + r]
        pltpu.make_async_copy(
            tok_hbm_ref.at[pl.ds(tok_id, 1)],      # (1, H) row in HBM
            gather_buf.at[pl.ds(r, 1)],            # (1, H) row in VMEM
            dma_sem,
        ).start()
        return carry

    lax.fori_loop(0, T, _issue, 0)

    def _wait(r, carry):
        # wait() only needs the semaphore + transfer size; every copy is (1, H).
        pltpu.make_async_copy(
            tok_hbm_ref.at[pl.ds(0, 1)],
            gather_buf.at[pl.ds(0, 1)],
            dma_sem,
        ).wait()
        return carry

    lax.fori_loop(0, T, _wait, 0)

    # --- combine --------------------------------------------------------------
    # Segment embedding: num_embeddings == 1, so the lookup is row 0 broadcast
    # over the tile (PyTorch would raise an index error for any other id).
    out_ref[...] = (gather_buf[...] + pos_ref[...] + seg_tab_ref[...]).astype(out_ref.dtype)


def embeddings_forward(input_ids, segment_ids, tok_table, seg_table, pos_enc, *,
                       seq_tile=256):
    """input_ids, segment_ids: (B, S) int; tok_table: (V, H); seg_table: (1, H);
    pos_enc: (S, H).  Returns (B, S, H) in tok_table.dtype."""
    B, S = input_ids.shape
    V, H = tok_table.shape

    seq_tile = min(seq_tile, S)
    if S % seq_tile != 0:
        raise ValueError(f"S={S} must be divisible by seq_tile={seq_tile}")
    if seq_tile != S and seq_tile % 8 != 0:
        raise ValueError("seq_tile must be a multiple of 8 (sublane constraint)")
    n_s = S // seq_tile

    # Glue (plain JAX): flatten ids; NO per-batch replication of pos_enc.
    ids_flat = input_ids.reshape(B * S).astype(jnp.int32)
    seg_flat = segment_ids.reshape(B * S).astype(jnp.int32)
    pos_enc = pos_enc.astype(tok_table.dtype)
    seg_table = seg_table.astype(tok_table.dtype)

    out_flat = pl.pallas_call(
        embeddings_kernel,
        out_shape=jax.ShapeDtypeStruct((B * S, H), tok_table.dtype),
        grid_spec=pltpu.PrefetchScalarGridSpec(
            num_scalar_prefetch=2,                 # ids, segment ids -> SMEM
            grid=(n_s, B),                         # batch innermost: pos tile reused from VMEM
            in_specs=[
                pl.BlockSpec(memory_space=pl.ANY),                              # token table (HBM)
                pl.BlockSpec((1, H), lambda s, b, ids, segs: (0, 0)),           # segment table
                pl.BlockSpec((seq_tile, H), lambda s, b, ids, segs: (s, 0)),    # positional tile
            ],
            out_specs=pl.BlockSpec((seq_tile, H),
                                   lambda s, b, ids, segs: (b * n_s + s, 0)),
            scratch_shapes=[
                pltpu.VMEM((seq_tile, H), tok_table.dtype),   # gathered-row buffer
                pltpu.SemaphoreType.DMA(()),                  # row-gather semaphore
            ],
        ),
        compiler_params=pltpu.CompilerParams(
            dimension_semantics=("parallel", "arbitrary")),
    )(ids_flat, seg_flat, tok_table, seg_table, pos_enc)

    return out_flat.reshape(B, S, H)


def sinusoidal_positional_encoding(seq_len, hidden):
    pos = jnp.arange(seq_len, dtype=jnp.float32)[:, None]          # (S, 1)
    i = jnp.arange(hidden // 2, dtype=jnp.float32)[None, :]        # (1, H/2)
    angles = pos / jnp.power(10000.0, 2.0 * i / hidden)
    return jnp.concatenate([jnp.sin(angles), jnp.cos(angles)], axis=-1)  # (S, H)


if __name__ == "__main__":
    # Small shapes consistent with the module's forward (H chosen lane-dense).
    B, S, H, V = 2, 8, 128, 64

    key = jax.random.PRNGKey(0)
    k_tok, k_seg, k_ids = jax.random.split(key, 3)

    # Deterministic "parameters" (nn.Embedding weight shapes from __init__).
    tok_table = 0.02 * jax.random.normal(k_tok, (V, H), dtype=jnp.float32)
    seg_table = 0.02 * jax.random.normal(k_seg, (1, H), dtype=jnp.float32)
    pos_enc = sinusoidal_positional_encoding(S, H)                  # (S, H), i.e. (1, S, H) pre-expand

    input_ids = jax.random.randint(k_ids, (B, S), 0, V, dtype=jnp.int32)
    segment_ids = jnp.zeros((B, S), dtype=jnp.int32)                # only index 0 is valid

    out = embeddings_forward(input_ids, segment_ids, tok_table, seg_table, pos_enc)
    out = jax.block_until_ready(out)

    # Pure-JAX reference (training=False -> no dropout).
    ref = (jnp.take(tok_table, input_ids, axis=0)
           + pos_enc[None, :, :]
           + jnp.take(seg_table, segment_ids, axis=0))

    assert out.shape == (B, S, H) and out.dtype == jnp.float32
    assert jnp.allclose(out, ref, atol=1e-6, rtol=1e-6), "mismatch vs reference"
    print("KERNEL_OK")
</pallas_src>

<mosaic_0001>
module attributes {stable_mosaic.version = 11 : i64} {
  func.func @embeddings_kernel(%arg0: i32, %arg1: i32, %arg2: memref<16xi32, #tpu.memory_space<smem>>, %arg3: memref<16xi32, #tpu.memory_space<smem>>, %arg4: memref<64x128xf32, #tpu.memory_space<any>>, %arg5: memref<1x128xf32, #tpu.memory_space<vmem>>, %arg6: memref<8x128xf32, #tpu.memory_space<vmem>>, %arg7: memref<8x128xf32, #tpu.memory_space<vmem>>, %arg8: memref<8x128xf32, #tpu.memory_space<vmem>>, %arg9: memref<!tpu.dma_semaphore, #tpu.memory_space<semaphore_mem>>) attributes {dimension_semantics = [#tpu.dimension_semantics<parallel>, #tpu.dimension_semantics<arbitrary>], iteration_bounds = array<i64: 1, 2>, scalar_prefetch = 2 : i64, scratch_operands = 2 : i64, tpu.core_type = #tpu.core_type<tc>, window_params = [{}, {pipeline_mode = #tpu.pipeline_mode<synchronous>, transform_indices = @transform_1, window_bounds = array<i64: 1, 128>}, {transform_indices = @transform_2, window_bounds = array<i64: 8, 128>}, {transform_indices = @transform_3, window_bounds = array<i64: 8, 128>}]} {
    %c8_i32 = arith.constant 8 : i32
    %0 = arith.muli %arg1, %c8_i32 : i32
    %c8_i32_0 = arith.constant 8 : i32
    %1 = arith.muli %arg0, %c8_i32_0 : i32
    %2 = arith.addi %0, %1 : i32
    %c0_i32 = arith.constant 0 : i32
    %c8_i32_1 = arith.constant 8 : i32
    %3 = arith.addi %c0_i32, %c8_i32_1 : i32
    %c1_i32 = arith.constant 1 : i32
    scf.for %arg10 = %c0_i32 to %3 step %c1_i32  : i32 {
      %12 = arith.addi %2, %arg10 : i32
      %13 = arith.index_cast %12 : i32 to index
      %14 = memref.load %arg2[%13] : memref<16xi32, #tpu.memory_space<smem>>
      %c0_i32_13 = arith.constant 0 : i32
      %15 = tpu.memref_slice %arg4[%14, %c0_i32_13] : memref<64x128xf32, #tpu.memory_space<any>> -> memref<1x128xf32, #tpu.memory_space<any>>
      %c0_i32_14 = arith.constant 0 : i32
      %16 = tpu.memref_slice %arg8[%arg10, %c0_i32_14] : memref<8x128xf32, #tpu.memory_space<vmem>> -> memref<1x128xf32, #tpu.memory_space<vmem>>
      tpu.enqueue_dma source(%15 : memref<1x128xf32, #tpu.memory_space<any>>) target(%16 : memref<1x128xf32, #tpu.memory_space<vmem>>) target_semaphore(%arg9 : memref<!tpu.dma_semaphore, #tpu.memory_space<semaphore_mem>>)
    }
    %c8_i32_2 = arith.constant 8 : i32
    %c0_i32_3 = arith.constant 0 : i32
    %c8_i32_4 = arith.constant 8 : i32
    %4 = arith.addi %c0_i32_3, %c8_i32_4 : i32
    %c1_i32_5 = arith.constant 1 : i32
    scf.for %arg10 = %c0_i32_3 to %4 step %c1_i32_5  : i32 {
      %c0_i32_13 = arith.constant 0 : i32
      %c0_i32_14 = arith.constant 0 : i32
      %12 = tpu.memref_slice %arg4[%c0_i32_13, %c0_i32_14] : memref<64x128xf32, #tpu.memory_space<any>> -> memref<1x128xf32, #tpu.memory_space<any>>
      %c0_i32_15 = arith.constant 0 : i32
      %c0_i32_16 = arith.constant 0 : i32
      %13 = tpu.memref_slice %arg8[%c0_i32_15, %c0_i32_16] : memref<8x128xf32, #tpu.memory_space<vmem>> -> memref<1x128xf32, #tpu.memory_space<vmem>>
      tpu.wait_dma2 semaphore(%arg9 : memref<!tpu.dma_semaphore, #tpu.memory_space<semaphore_mem>>) src(%12 : memref<1x128xf32, #tpu.memory_space<any>>) dst(%13 : memref<1x128xf32, #tpu.memory_space<vmem>>)
    }
    %c0 = arith.constant 0 : index
    %c0_6 = arith.constant 0 : index
    %5 = vector.load %arg8[%c0, %c0_6] : memref<8x128xf32, #tpu.memory_space<vmem>>, vector<8x128xf32>
    %c0_7 = arith.constant 0 : index
    %c0_8 = arith.constant 0 : index
    %6 = vector.load %arg6[%c0_7, %c0_8] : memref<8x128xf32, #tpu.memory_space<vmem>>, vector<8x128xf32>
    %7 = arith.addf %5, %6 : vector<8x128xf32>
    %c0_9 = arith.constant 0 : index
    %c0_10 = arith.constant 0 : index
    %8 = vector.load %arg5[%c0_9, %c0_10] : memref<1x128xf32, #tpu.memory_space<vmem>>, vector<1x128xf32>
    %9 = vector.broadcast %8 : vector<1x128xf32> to vector<8x128xf32>
    %10 = arith.addf %7, %9 : vector<8x128xf32>
    %c0_11 = arith.constant 0 : index
    %c0_12 = arith.constant 0 : index
    %11 = vector.load %arg7[%c0_11, %c0_12] : memref<8x128xf32, #tpu.memory_space<vmem>>, vector<8x128xf32>
    tpu.vector_store %arg7[%c0_11, %c0_12], %10 {strides = array<i32>} : memref<8x128xf32, #tpu.memory_space<vmem>>, vector<8x128xf32>,
    return
  }
  func.func @transform_1(%arg0: i32, %arg1: i32, %arg2: memref<16xi32, #tpu.memory_space<smem>>, %arg3: memref<16xi32, #tpu.memory_space<smem>>) -> (i32, i32) {
    %c0_i32 = arith.constant 0 : i32
    %c0_i32_0 = arith.constant 0 : i32
    %c0_i32_1 = arith.constant 0 : i32
    return %c0_i32, %c0_i32_0 : i32, i32
  }
  func.func @transform_2(%arg0: i32, %arg1: i32, %arg2: memref<16xi32, #tpu.memory_space<smem>>, %arg3: memref<16xi32, #tpu.memory_space<smem>>) -> (i32, i32) {
    %c0_i32 = arith.constant 0 : i32
    %c0_i32_0 = arith.constant 0 : i32
    return %arg0, %c0_i32 : i32, i32
  }
  func.func @transform_3(%arg0: i32, %arg1: i32, %arg2: memref<16xi32, #tpu.memory_space<smem>>, %arg3: memref<16xi32, #tpu.memory_space<smem>>) -> (i32, i32) {
    %c1_i32 = arith.constant 1 : i32
    %0 = arith.muli %arg1, %c1_i32 : i32
    %1 = arith.addi %0, %arg0 : i32
    %c0_i32 = arith.constant 0 : i32
    %c0_i32_0 = arith.constant 0 : i32
    return %1, %c0_i32 : i32, i32
  }
}

</mosaic_0001>

<bundles_post_ra>
// kernel: tpu_custom_call.1
= control target key start
LH: loop header
LB: loop body
LE: loop exit
PB: predicated region body
PF: predicated region fallthrough
CT: control target
= control target key end

     0   :  { %s587_s18 = smov [#allocation5]   ;;  %s779_s0 = inlined_call_operand.hbm [shape: s32[16], index: 0, kind: input, shape index: {}]   ;;  %s780_s2 = inlined_call_operand.hbm [shape: f32[64,128], index: 2, kind: input, shape index: {}]   ;;  %s781_s3 = inlined_call_operand.vmem [shape: f32[1,128], index: 3, kind: input, shape index: {}]   ;;  %s782_s4 = inlined_call_operand.hbm [shape: f32[8,128], index: 4, kind: input, shape index: {}]   ;;  %s783_s5 = inlined_call_operand.hbm [shape: f32[16,128], index: 5, kind: output, shape index: {}]   ;;  %s784_s1 = inlined_call_operand.vmem [shape: s32[16], index: 1, kind: input, shape index: {}]  }
   0x1   :  { %11 = dma.hbm_to_smem %s779_s0, 16, %s587_s18, [#allocation4] }
   0x2   :  { %s12_s23 = sshll.u32 %s784_s1, 4  ;;  %s13_s23 = int_to_ptr.vmem [resolvable:$true] %s12_s23 }
   0x3   :  { %s425_s24 = scalar_lea.vmem %s13_s23, 16  ;;  %p430_p1 = scmp.lt.s32.totalorder %s13_s23, %s13_s23 }
   0x4   :  { %p426_p0 = scmp.ne.s32.totalorder %s13_s23, %s425_s24  ;;  %p431_p2 = scmp.lt.s32.totalorder %s425_s24, %s425_s24 }
   0x6   :  { %p432_p3 = por %p431_p2, %p430_p1 }
   0x8   :  { %p433_p4 = pnand %p432_p3, %p426_p0 }
   0xa   :  { %436 = shalt.err (!%p433_p4)  }
   0xb   :  { %s588_s25 = smov [#allocation6]  }
   0xc   :  { %15 = dma.vmem_to_smem %s13_s23, 16, %s588_s25, [#allocation4] }
   0xd   :  { %543 = dma.done.wait [#allocation4], 32 }
   0xe   :  { %544 = vsyncadd [#allocation4], 4294967264 }
   0xf   :  { %17 = sfence }
  0x10   :  { %18 = vsyncpa [#allocation8], 0 }
  0x11   :  { %19 = vsyncpa [#allocation9], 0 }
  0x12   :  { %21 = vsyncpa [#allocation9 + $0x1], 0  ;;  %s628_s0 = smov 0   ;;  %s630_s26 = smov 0  }
  0x13   :  { %s632_s1 = smov 0   ;;  %s634_s27 = smov 0  }
  0x14   :  { %s636_s28 = smov 0   ;;  %s638_s29 = smov 0  }
  0x15 LB: > { %s318_s30 = sadd.s32 4294967295, %s577_s29   ;;  %s319_s6 = sadd.s32 4294967294, %s577_s29   ;;  %s577_s29 = sphi %s638_s29, %s27_s29   ;;  %s573_s28 = sphi %s636_s28, %s797_s28   ;;  %s569_s27 = sphi %s634_s27, %s796_s27   ;;  %s565_s1 = sphi %s632_s1, %s795_s1   ;;  %s561_s26 = sphi %s630_s26, %s794_s26   ;;  %s557_s0 = sphi %s628_s0, %s793_s0  }
  0x16   : > { %s36_s7 = sadd.s32 1, %s573_s28  ;;  %s95_s8 = sadd.s32 1, %s565_s1 }
  0x17   : > { %p37_p5 = scmp.ge.s32.totalorder %s36_s7, 2  ;;  %p105_p6 = scmp.ne.s32.totalorder %s565_s1, %s561_s26 }
  0x18   : > { %p106_p7 = scmp.eq.s32.totalorder %s318_s30, 1  ;;  %p111_p8 = scmp.ne.s32.totalorder %s561_s26, %s557_s0 }
  0x19   : > { %s799_s7 = smov (%p37_p5, %s36_s7), 0  ;;  %p112_p10 = scmp.eq.s32.totalorder %s319_s6, 1 }
  0x1a   : > { %p668_p9 = por %p106_p7, %p105_p6  ;;  %s92_s10 = ssub.s32 %s573_s28, %s799_s7 }
  0x1b   : > { %p320_p11 = scmp.ge.s32.totalorder %s577_s29, 1  ;;  %p93_p12 = scmp.eq.s32.totalorder %s92_s10, 0 }
  0x1c   : > { %p675_p13 = por %p112_p10, %p111_p8  ;;  %p119_p0 = scmp.lt.s32.totalorder %s577_s29, 3 }
  0x1d   : > { %s681_s12 = scalar_select %p93_p12, %s565_s1, %s95_s8  }
  0x1e   : > { %p683_p1 = pnand %p320_p11, %p119_p0  ;;  %p687_p2 = scmp.eq.s32.totalorder %s318_s30, 0 }
  0x1f   : > { %s589_s15 = smov [#allocation7]  }
  0x20   : > { %p339_p3 = pneg %p683_p1  ;;  %s137_s16 = sshll.u32 %s589_s15, 4  ;;  %s138_s16 = int_to_ptr.vmem [resolvable:$true] %s137_s16 }
  0x21   : > { %s448_s17 = scalar_lea.vmem %s138_s16, 128  ;;  %p456_p10 = scmp.lt.s32.totalorder %s138_s16, %s138_s16 }
  0x22   : > { %p340_p4 = pnand %p687_p2, %p339_p3  ;;  %p449_p6 = scmp.ne.s32.totalorder %s138_s16, %s448_s17 }
  0x23   : > { %p457_p11 = scmp.lt.s32.totalorder %s448_s17, %s448_s17 }
  0x24   : > { %p439_p5 = pneg %p340_p4 }
  0x25   : > { %p458_p12 = por %p457_p11, %p456_p10 }
  0x26   : > { %p451_p7 = pnand %p449_p6, %p439_p5 }
  0x28   : > { %p452_p8 = pneg %p451_p7 }
  0x2a   : > { %p459_p0 = pnand %p458_p12, %p452_p8 }
  0x2c   : > { %462 = shalt.err (!%p459_p0)
}
  0x2d   : > { %342 = dma.hbm_to_vmem [thread:$0]  (!%p340_p4), %s782_s4, 128, %s138_s16, [#allocation8]  }
  0x2e   : > { %150 = sbr.rel (%p683_p1) target bundleno = 119 (0x77), region = 28 }
  0x33   : > { %546 = dma.done.wait (%p687_p2), [#allocation8], 128  }
  0x34   : > { %548 = vsyncadd (%p687_p2), [#allocation8], 4294967168  ;;  %s785_s20 = sand.u32 1, %s561_s26   ;;  %s325_s21 = sshll.u32 %s569_s27, 3 }
  0x35   : > { %s708_s22 = sshll.u32 %s785_s20, 3  ;;  %s711_s24 = smov 0  }
  0x36 LB: >> { %s177_s25 = sadd.s32 %s581_s24, %s325_s21  ;;  %s181_s6 = scalar_lea.vmem [#allocation2], %s581_s24  ;;  %s581_s24 = sphi %s711_s24, %s176_s24  }
  0x37   : >> { %s178_s30 = sld [smem:[#allocation5 + %s177_s25]]  ;;  %s189_s8 = sshll.u32 %s181_s6, 4  ;;  %s190_s8 = int_to_ptr.vmem [resolvable:$true] %s189_s8 }
  0x38   : >> { %s465_s19 = scalar_lea.hbm %s780_s2, 1024 }
  0x3d   : >> { %s326_s10 = sshll.u32 %s178_s30, 4 }
  0x3e   : >> { %s180_s15 = scalar_lea.hbm %s780_s2, %s326_s10 }
  0x3f   : >> { %s463_s16 = scalar_lea.hbm %s180_s15, 16  ;;  %p466_p2 = scmp.lt.s32.totalorder %s180_s15, %s780_s2 }
  0x40   : >> { %p464_p1 = scmp.ne.s32.totalorder %s180_s15, %s463_s16  ;;  %p467_p3 = scmp.lt.s32.totalorder %s465_s19, %s463_s16 }
  0x42   : >> { %p468_p4 = por %p467_p3, %p466_p2 }
  0x44   : >> { %p469_p5 = pnand %p468_p4, %p464_p1 }
  0x46   : >> { %472 = shalt.err (!%p469_p5)  }
  0x47   : >> { %s473_s25 = scalar_lea.vmem %s190_s8, 16  ;;  %s590_s30 = smov [#allocation2]  }
  0x48   : >> { %p474_p6 = scmp.ne.s32.totalorder %s190_s8, %s473_s25  ;;  %s475_s6 = sshll.u32 %s590_s30, 4  ;;  %s476_s6 = int_to_ptr.vmem [resolvable:$false] %s475_s6 }
  0x49   : >> { %s477_s10 = scalar_lea.vmem %s476_s6, 128  ;;  %p478_p7 = scmp.lt.s32.totalorder %s190_s8, %s476_s6 }
  0x4a   : >> { %p479_p8 = scmp.lt.s32.totalorder %s477_s10, %s473_s25 }
  0x4c   : >> { %p480_p10 = por %p479_p8, %p478_p7 }
  0x4e   : >> { %p481_p11 = pnand %p480_p10, %p474_p6 }
  0x50   : >> { %484 = shalt.err (!%p481_p11)  }
  0x51   : >> { %192 = dma.hbm_to_vmem [thread:$0]  %s180_s15, 16, %s190_s8, [#allocation3] }
  0x52   : >> { %s176_s24 = sadd.s32 1, %s581_s24  }
  0x53   : >> { %p173_p12 = scmp.ge.s32.totalorder %s176_s24, 8  }
  0x54   : > { %s583_s20 = smov (%p173_p12), 0  }
  0x55   : > { %175 = sbr.rel (!%p173_p12) target bundleno = 54 (0x36), region = 86 }
  0x5a LB: >> { %549 = dma.done.wait [#allocation3], 16  ;;  %s585_s20 = sphi %s583_s20, %s198_s20  }
  0x5b   : >> { %550 = vsyncadd [#allocation3], 4294967280  ;;  %s198_s20 = sadd.s32 1, %s585_s20  }
  0x5c   : >> { %p195_p0 = scmp.ge.s32.totalorder %s198_s20, 8  }
  0x5d   : > { %v202_v0 = vld [vmem:[#allocation2] sm:$0xff] (%p195_p0)  ;;  %v203_v1 = vld [vmem:[#allocation7] sm:$0xff] (%p195_p0)  ;;  %s329_s21 = sshll.u32 (%p195_p0), %s569_s27, 7  ;;  %s790_s8 = scalar_lea.vmem (%p195_p0), [#allocation10], %s708_s22 }
  0x5e   : > { %197 = sbr.rel (!%p195_p0) target bundleno = 90 (0x5a), region = 97  ;;  %v327_v2 = vld [vmem:[%s781_s3] ss:$0 sm:$0xff] (%p195_p0)  ;;  %v204_v3 = vadd.f32 (%p195_p0), %v203_v1, %v202_v0  ;;  %s229_s13 = sshll.u32 (%p195_p0), %s790_s8, 4  ;;  %s230_s13 = int_to_ptr.vmem [resolvable:$true] %s229_s13 }
  0x5f   : > { %s227_s16 = scalar_lea.hbm (%p195_p0), %s783_s5, %s329_s21  ;;  %s791_s17 = smov (%p195_p0), %s790_s8 }
  0x60   : > { %v212_v4 = vadd.f32 (%p195_p0), %v327_v2, %v204_v3  ;;  %s792_s18 = sand.u32 (%p195_p0), 1, %s561_s26   ;;  %s485_s25 = scalar_lea.vmem (%p195_p0), %s230_s13, 128 }
  0x61   : > { %s215_s19 = scalar_lea.sflag (%p195_p0), [#allocation9], %s792_s18  ;;  %p486_p1 = scmp.ne.s32.totalorder (%p195_p0), %s230_s13, %s485_s25 }
  0x62   : > { %213 = vst [vmem:[%s791_s17] sm:$0xff] (%p195_p0), %v212_v4  ;;  %s591_s30 = smov (%p195_p0), [#allocation10]  }
  0x63   : > { %p487_p2 = pnand %p486_p1, %p668_p9  ;;  %s489_s27 = sshll.u32 %s591_s30, 4  ;;  %s490_s27 = int_to_ptr.vmem [resolvable:$false] %s489_s27 }
  0x64   : > { %s491_s6 = scalar_lea.vmem %s490_s27, 256  ;;  %p492_p4 = scmp.lt.s32.totalorder %s230_s13, %s490_s27 }
  0x65   : > { %p488_p3 = pneg %p487_p2  ;;  %p493_p5 = scmp.lt.s32.totalorder %s491_s6, %s485_s25 }
  0x67   : > { %p494_p6 = por %p493_p5, %p492_p4 }
  0x69   : > { %p495_p7 = pnand %p494_p6, %p488_p3 }
  0x6b   : > { %498 = shalt.err (!%p495_p7)
}
  0x6c   : > { %s499_s10 = scalar_lea.hbm %s227_s16, 128  ;;  %s503_s23 = scalar_lea.hbm %s783_s5, 256 }
  0x6d   : > { %p500_p8 = scmp.ne.s32.totalorder %s227_s16, %s499_s10  ;;  %p504_p12 = scmp.lt.s32.totalorder %s227_s16, %s783_s5 }
  0x6e   : > { %p505_p0 = scmp.lt.s32.totalorder %s503_s23, %s499_s10 }
  0x6f   : > { %p501_p10 = pnand %p500_p8, %p668_p9 }
  0x70   : > { %p506_p1 = por %p505_p0, %p504_p12 }
  0x71   : > { %p502_p11 = pneg %p501_p10 }
  0x73   : > { %p507_p2 = pnand %p506_p1, %p502_p11 }
  0x75   : > { %510 = shalt.err (!%p507_p2)
}
  0x76   : > { %337 = dma.vmem_to_hbm [thread:$0]  (%p668_p9), %s230_s13, 128, %s227_s16, %s215_s19  }
  0x77 PF: > { %p349_p3 = scmp.ge.s32.totalorder %s577_s29, 2  ;;  %s241_s8 = sand.u32 1, %s557_s0  }
  0x78   : > { %s242_s14 = scalar_lea.sflag [#allocation9], %s241_s8 }
  0x79   : > { %p344_p4 = pnand %p349_p3, %p675_p13 }
  0x7b   : > { %p345_p5 = pneg %p344_p4 }
  0x7d   : > { %552 = dma.done.wait (%p345_p5), %s242_s14, 128  }
  0x7e   : > { %554 = vsyncadd (%p345_p5), %s242_s14, 4294967168  ;;  %s27_s29 = sadd.s32 1, %s577_s29   ;;  %s793_s0 = smov %s561_s26 }
  0x7f   : > { %p24_p6 = scmp.ge.s32.totalorder %s27_s29, 4   ;;  %s794_s26 = smov %s565_s1 }
  0x80   : > { %s795_s1 = smov %s681_s12  ;;  %s796_s27 = smov %s573_s28 }
  0x81   : > { %s797_s28 = smov %s799_s7  ;;  %26 = sbr.rel (!%p24_p6) target bundleno = 21 (0x15), region = 108 }
  0x86   :  { %247 = vsyncpa [#allocation8], 1 }
  0x87   :  { %249 = vsyncpa [#allocation8 + $0x1], 1 }
  0x88   :  { %250 = vsyncpa [#allocation9], 1 }
  0x89   :  { %252 = vsyncpa [#allocation9 + $0x1], 1 }
  0x8a   :  { %253 = vsyncmov [#allocation3] }
  0x8d   :  { %s254_s9 = vpop.sfrf %253 }
  0x8e   :  { %p332_p9 = scmp.ne.s32.totalorder %s254_s9, 0 }
  0x90   :  { %258 = shalt.err (%p332_p9)  }

</bundles_post_ra>
